<compile_context>
chip_gen: v5e
topology: v5e:2x2
jax: 0.10.0
libtpu: 0.0.40
codegen_flags: <defaults>
</compile_context>

<pallas_src>
import functools

import jax
import jax.numpy as jnp
from jax.experimental import pallas as pl
from jax.experimental.pallas import tpu as pltpu


def _round_up(a, b):
    return -(-a // b) * b


def triplet_loss_kernel(e1_ref, sq1_ref, ap2_ref, e2neg_ref, sq2_ref,
                        hinge_ref, hit_ref, an2_min_ref, *, margin, bf16_matmul):
    """Grid = (row blocks of e1, column blocks of e2).

    e1_ref    : (tm, d)   anchor row block (input dtype, zero-padded past n)
    sq1_ref   : (tm, 1)   f32 |e1|^2 per row
    ap2_ref   : (tm, 1)   f32 |e1 - e2|^2 per row (dist_ap^2)
    e2neg_ref : (tn, d)   -2 * e2 column block (input dtype, zero-padded)
    sq2_ref   : (1, tn)   f32 |e2|^2 per column (+inf in padded columns)
    hinge_ref : (tm, 1)   f32 per-row hinge output
    hit_ref   : (tm, 1)   i32 per-row (dist_an >= dist_ap) output
    an2_min_ref: (tm, 1)  f32 VMEM scratch, running column-min
    """
    i = pl.program_id(0)
    j = pl.program_id(1)
    tm = e1_ref.shape[0]
    tn = e2neg_ref.shape[0]

    @pl.when(j == 0)
    def _init():
        an2_min_ref[...] = jnp.full_like(an2_min_ref, jnp.inf)

    lhs = e1_ref[...]
    rhs = e2neg_ref[...]
    if bf16_matmul:
        lhs = lhs.astype(jnp.bfloat16)
        rhs = rhs.astype(jnp.bfloat16)

    # Single MXU contraction (K = d, stays 128-aligned): m[r, c] = -2 <e1_r, e2_c>
    m = jax.lax.dot_general(lhs, rhs, (((1,), (1,)), ((), ())),
                            preferred_element_type=jnp.float32)          # (tm, tn)
    # + |e2_c|^2 : one VPU pass hidden under MXU slack (+inf in padded columns).
    m = m + sq2_ref[...]

    # Exclude the matched pair: global column == global row.  Only a (1, tn)
    # iota and the (tm, 1) row index are materialized.
    row_vec = i * tm + jax.lax.broadcasted_iota(jnp.int32, (tm, 1), 0)
    col_ids = j * tn + jax.lax.broadcasted_iota(jnp.int32, (1, tn), 1)
    part_min = jnp.min(jnp.where(col_ids == row_vec, jnp.inf, m),
                       axis=1, keepdims=True)                             # (tm, 1)
    an2_min_ref[...] = jnp.minimum(an2_min_ref[...], part_min)

    @pl.when(j == pl.num_programs(1) - 1)
    def _finalize():
        an2 = jnp.maximum(an2_min_ref[...] + sq1_ref[...], 1e-12)
        dist_an = jnp.sqrt(an2)                                           # sqrt on (tm, 1) only
        dist_ap = jnp.sqrt(jnp.maximum(ap2_ref[...], 1e-12))
        hinge_ref[...] = jnp.maximum(dist_ap - dist_an + jnp.float32(margin), 0.0)
        hit_ref[...] = (dist_an >= dist_ap).astype(jnp.int32)


def _resident_spec(block_shape, index_map):
    """Single-buffered spec for inputs whose index_map is constant."""
    try:
        return pl.BlockSpec(block_shape, index_map, pipeline_mode=pl.Buffered(1))
    except Exception:  # older/newer API without pipeline_mode: fall back to default
        return pl.BlockSpec(block_shape, index_map)


def _choose_tiles(n, d, itemsize):
    """Pick (block_rows, block_cols, columns_resident, vmem_limit_bytes)."""
    try:
        vmem_cap = int(pltpu.get_tpu_info().vmem_capacity_bytes)
    except Exception:
        vmem_cap = 64 * 1024 * 1024        # conservative (v7x per-core)
    budget = (vmem_cap * 2) // 5           # leave headroom for pipeline/compiler
    vmem_limit = (vmem_cap * 3) // 4

    def usage(tm, tn, resident):
        return (
            2 * tm * d * itemsize                                # e1 (double-buffered)
            + (1 if resident else 2) * tn * (d * itemsize + 4)   # -2*e2 + |e2|^2 row
            + 3 * tm * tn * 4                                    # live (tm, tn) f32 temps
            + 10 * tm * 4                                        # (tm,1) inputs/outputs/scratch
        )

    # 1) whole problem as a single row block, negatives fully resident.
    tm_full = _round_up(n, 8)
    if tm_full <= 1024 and usage(tm_full, n, True) <= budget:
        return tm_full, n, True, vmem_limit
    # 2) row-blocked, negatives fully resident (single column block).
    for tm in (512, 256, 128, 64, 32, 16, 8):
        if usage(tm, n, True) <= budget:
            return tm, n, True, vmem_limit
    # 3) row- and column-blocked (bounds VMEM independently of n).
    for tm in (512, 256, 128, 64, 32, 16, 8):
        for tn in (1024, 512, 256, 128):
            if usage(tm, tn, False) <= budget:
                return tm, tn, False, vmem_limit
    return 8, 128, False, vmem_limit


def triplet_loss(x, target, batch_size, margin=0.5, bf16_matmul=False):
    """x: (2*batch_size, feat_dim) -> (loss, correct). `target` unused (parity)."""
    del target
    n = int(batch_size)
    d = int(x.shape[-1])
    itemsize = jnp.dtype(x.dtype).itemsize

    e1 = x[:n]
    e2 = x[n:2 * n]

    # Hoisted O(n*d) precomputation (removes per-block e2 DMA / f32 upcasts):
    e1f = e1.astype(jnp.float32)
    e2f = e2.astype(jnp.float32)
    sq1 = jnp.sum(e1f * e1f, axis=1, keepdims=True)          # (n, 1) f32
    sq2 = jnp.sum(e2f * e2f, axis=1, keepdims=True).T        # (1, n) f32 (kept in f32)
    diff = e1f - e2f
    ap2 = jnp.sum(diff * diff, axis=1, keepdims=True)        # (n, 1) f32, dist_ap^2
    e2neg = e2 * jnp.asarray(-2.0, dtype=e2.dtype)           # (n, d) input dtype for the MXU

    tm, tn, col_resident, vmem_limit = _choose_tiles(n, d, itemsize)
    num_i = -(-n // tm)
    n_rows = num_i * tm
    if col_resident:
        num_j, n_cols = 1, n
    else:
        num_j = -(-n // tn)
        n_cols = num_j * tn

    e1p = jnp.pad(e1, ((0, n_rows - n), (0, 0))) if n_rows != n else e1
    sq1p = jnp.pad(sq1, ((0, n_rows - n), (0, 0))) if n_rows != n else sq1
    ap2p = jnp.pad(ap2, ((0, n_rows - n), (0, 0))) if n_rows != n else ap2
    if n_cols != n:
        e2negp = jnp.pad(e2neg, ((0, n_cols - n), (0, 0)))
        # +inf in padded columns keeps them out of the hard-negative min.
        sq2p = jnp.pad(sq2, ((0, 0), (0, n_cols - n)), constant_values=float("inf"))
    else:
        e2negp, sq2p = e2neg, sq2

    e2_blk = (n_cols if col_resident else tn, d)
    sq2_blk = (1, n_cols if col_resident else tn)
    if col_resident:
        e2_spec = _resident_spec(e2_blk, lambda i, j: (0, 0))
        sq2_spec = _resident_spec(sq2_blk, lambda i, j: (0, 0))
    else:
        e2_spec = pl.BlockSpec(e2_blk, lambda i, j: (j, 0))
        sq2_spec = pl.BlockSpec(sq2_blk, lambda i, j: (0, j))

    kernel = functools.partial(triplet_loss_kernel, margin=float(margin),
                               bf16_matmul=bool(bf16_matmul))
    cost = pl.CostEstimate(
        flops=2 * n * n * d,
        transcendentals=2 * n,
        bytes_accessed=((n_rows + n_cols) * d * itemsize
                        + (2 * n_rows + n_cols) * 4      # sq1, ap2, sq2
                        + 2 * n_rows * 4),               # outputs
    )

    hinge, hits = pl.pallas_call(
        kernel,
        out_shape=(
            jax.ShapeDtypeStruct((n_rows, 1), jnp.float32),
            jax.ShapeDtypeStruct((n_rows, 1), jnp.int32),
        ),
        grid=(num_i, num_j),
        in_specs=[
            pl.BlockSpec((tm, d), lambda i, j: (i, 0)),   # e1 row block
            pl.BlockSpec((tm, 1), lambda i, j: (i, 0)),   # |e1|^2
            pl.BlockSpec((tm, 1), lambda i, j: (i, 0)),   # |e1 - e2|^2 (dist_ap^2)
            e2_spec,                                      # -2 * e2 (resident or column block)
            sq2_spec,                                     # |e2|^2 row (f32)
        ],
        out_specs=(
            pl.BlockSpec((tm, 1), lambda i, j: (i, 0)),
            pl.BlockSpec((tm, 1), lambda i, j: (i, 0)),
        ),
        scratch_shapes=[pltpu.VMEM((tm, 1), jnp.float32)],
        compiler_params=pltpu.CompilerParams(
            dimension_semantics=("parallel", "arbitrary"),
            vmem_limit_bytes=int(vmem_limit),
        ),
        cost_estimate=cost,
    )(e1p, sq1p, ap2p, e2negp, sq2p)

    loss = jnp.sum(hinge[:n, 0]) / jnp.float32(n)
    correct = 2 * jnp.sum(hits[:n, 0])
    return loss, correct


def _reference(x, batch_size, margin=0.5):
    """Pure-JAX reference mirroring the PyTorch forward, for a sanity check."""
    n = batch_size
    e1, e2 = x[:n].astype(jnp.float32), x[n:2 * n].astype(jnp.float32)
    d = (
        jnp.sum(e1 * e1, axis=1, keepdims=True)
        + jnp.sum(e2 * e2, axis=1, keepdims=True).T
        - 2.0 * e1 @ e2.T
    )
    d = jnp.sqrt(jnp.clip(d, 1e-12, None))
    eye = jnp.eye(n, dtype=bool)
    dist_ap = jnp.diag(d)
    dist_an = jnp.min(jnp.where(eye, jnp.inf, d), axis=1)
    loss = jnp.mean(jnp.maximum(dist_ap - dist_an + margin, 0.0))
    correct = 2 * jnp.sum(dist_an >= dist_ap)
    return loss, correct


if __name__ == "__main__":
    batch_size = 8
    feat_dim = 32
    margin = 0.5

    key = jax.random.PRNGKey(0)
    kx, kt = jax.random.split(key)
    # feature matrix with shape (2 * batch_size, feat_dim)
    x = jax.random.normal(kx, (2 * batch_size, feat_dim), dtype=jnp.float32)
    # labels (unused by the forward, kept for API parity)
    target = jax.random.randint(kt, (batch_size,), 0, 4, dtype=jnp.int32)

    loss, correct = triplet_loss(x, target, batch_size, margin)
    loss = jax.block_until_ready(loss)
    correct = jax.block_until_ready(correct)

    ref_loss, ref_correct = _reference(x, batch_size, margin)
    assert jnp.allclose(loss, ref_loss, atol=1e-4, rtol=1e-4), (loss, ref_loss)
    assert int(correct) == int(ref_correct), (correct, ref_correct)

    print("KERNEL_OK")
</pallas_src>

<mosaic_0001>
module attributes {stable_mosaic.version = 11 : i64} {
  func.func @triplet_loss_kernel(%arg0: i32, %arg1: i32, %arg2: memref<8x32xf32, #tpu.memory_space<vmem>>, %arg3: memref<8x1xf32, #tpu.memory_space<vmem>>, %arg4: memref<8x1xf32, #tpu.memory_space<vmem>>, %arg5: memref<8x32xf32, #tpu.memory_space<vmem>>, %arg6: memref<1x8xf32, #tpu.memory_space<vmem>>, %arg7: memref<8x1xf32, #tpu.memory_space<vmem>>, %arg8: memref<8x1xi32, #tpu.memory_space<vmem>>, %arg9: memref<8x1xf32, #tpu.memory_space<vmem>>) attributes {dimension_semantics = [#tpu.dimension_semantics<parallel>, #tpu.dimension_semantics<arbitrary>], iteration_bounds = array<i64: 1, 1>, scalar_prefetch = 0 : i64, scratch_operands = 1 : i64, tpu.core_type = #tpu.core_type<tc>, window_params = [{transform_indices = @transform_0, window_bounds = array<i64: 8, 32>}, {transform_indices = @transform_1, window_bounds = array<i64: 8, 1>}, {transform_indices = @transform_2, window_bounds = array<i64: 8, 1>}, {pipeline_mode = #tpu.pipeline_mode<synchronous>, transform_indices = @transform_3, window_bounds = array<i64: 8, 32>}, {pipeline_mode = #tpu.pipeline_mode<synchronous>, transform_indices = @transform_4, window_bounds = array<i64: 1, 8>}, {transform_indices = @transform_5, window_bounds = array<i64: 8, 1>}, {transform_indices = @transform_6, window_bounds = array<i64: 8, 1>}]} {
    %c0_i32 = arith.constant 0 : i32
    %0 = arith.cmpi eq, %arg1, %c0_i32 : i32
    %1 = arith.extui %0 : i1 to i32
    %c0_i32_0 = arith.constant 0 : i32
    %2 = arith.cmpi ne, %1, %c0_i32_0 : i32
    scf.if %2 {
      %cst_15 = arith.constant 0x7F800000 : f32
      %30 = vector.broadcast %cst_15 : f32 to vector<8x1xf32>
      %c0_16 = arith.constant 0 : index
      %c0_17 = arith.constant 0 : index
      %31 = vector.load %arg9[%c0_16, %c0_17] : memref<8x1xf32, #tpu.memory_space<vmem>>, vector<8x1xf32>
      tpu.vector_store %arg9[%c0_16, %c0_17], %30 {strides = array<i32>} : memref<8x1xf32, #tpu.memory_space<vmem>>, vector<8x1xf32>,
    } else {
    }
    %c0 = arith.constant 0 : index
    %c0_1 = arith.constant 0 : index
    %3 = vector.load %arg2[%c0, %c0_1] : memref<8x32xf32, #tpu.memory_space<vmem>>, vector<8x32xf32>
    %c0_2 = arith.constant 0 : index
    %c0_3 = arith.constant 0 : index
    %4 = vector.load %arg5[%c0_2, %c0_3] : memref<8x32xf32, #tpu.memory_space<vmem>>, vector<8x32xf32>
    %cst = arith.constant dense<0.000000e+00> : vector<8x8xf32>
    %5 = tpu.matmul %3, %4, %cst {dimension_numbers = #tpu.dot_dimension_numbers<[1], [1], [0], [0], [0, 0, 1, 0], [], []>} : vector<8x32xf32>, vector<8x32xf32>, vector<8x8xf32> -> vector<8x8xf32>
    %c0_4 = arith.constant 0 : index
    %c0_5 = arith.constant 0 : index
    %6 = vector.load %arg6[%c0_4, %c0_5] : memref<1x8xf32, #tpu.memory_space<vmem>>, vector<1x8xf32>
    %7 = vector.broadcast %6 : vector<1x8xf32> to vector<8x8xf32>
    %8 = arith.addf %5, %7 : vector<8x8xf32>
    %c8_i32 = arith.constant 8 : i32
    %9 = arith.muli %arg0, %c8_i32 : i32
    %10 = tpu.iota {dimensions = array<i32: 0>} : vector<8x1xi32>
    %11 = vector.broadcast %9 : i32 to vector<8x1xi32>
    %12 = arith.addi %11, %10 : vector<8x1xi32>
    %c8_i32_6 = arith.constant 8 : i32
    %13 = arith.muli %arg1, %c8_i32_6 : i32
    %14 = tpu.iota {dimensions = array<i32: 1>} : vector<1x8xi32>
    %15 = vector.broadcast %13 : i32 to vector<1x8xi32>
    %16 = arith.addi %15, %14 : vector<1x8xi32>
    %17 = vector.broadcast %16 : vector<1x8xi32> to vector<8x8xi32>
    %18 = vector.broadcast %12 : vector<8x1xi32> to vector<8x8xi32>
    %19 = arith.cmpi eq, %17, %18 : vector<8x8xi32>
    %cst_7 = arith.constant 0x7F800000 : f32
    %20 = vector.broadcast %cst_7 : f32 to vector<8x8xf32>
    %21 = arith.select %19, %20, %8 : vector<8x8xi1>, vector<8x8xf32>
    %cst_8 = arith.constant dense<0x7F800000> : vector<8xf32>
    %22 = vector.multi_reduction <minimumf>, %21, %cst_8 [1] : vector<8x8xf32> to vector<8xf32>
    %23 = vector.shape_cast %22 : vector<8xf32> to vector<8x1xf32>
    %c0_9 = arith.constant 0 : index
    %c0_10 = arith.constant 0 : index
    %24 = vector.load %arg9[%c0_9, %c0_10] : memref<8x1xf32, #tpu.memory_space<vmem>>, vector<8x1xf32>
    %25 = arith.minimumf %24, %23 : vector<8x1xf32>
    %c0_11 = arith.constant 0 : index
    %c0_12 = arith.constant 0 : index
    %26 = vector.load %arg9[%c0_11, %c0_12] : memref<8x1xf32, #tpu.memory_space<vmem>>, vector<8x1xf32>
    tpu.vector_store %arg9[%c0_11, %c0_12], %25 {strides = array<i32>} : memref<8x1xf32, #tpu.memory_space<vmem>>, vector<8x1xf32>,
    %c0_i32_13 = arith.constant 0 : i32
    %27 = arith.cmpi eq, %arg1, %c0_i32_13 : i32
    %28 = arith.extui %27 : i1 to i32
    %c0_i32_14 = arith.constant 0 : i32
    %29 = arith.cmpi ne, %28, %c0_i32_14 : i32
    scf.if %29 {
      %c0_15 = arith.constant 0 : index
      %c0_16 = arith.constant 0 : index
      %30 = vector.load %arg9[%c0_15, %c0_16] : memref<8x1xf32, #tpu.memory_space<vmem>>, vector<8x1xf32>
      %c0_17 = arith.constant 0 : index
      %c0_18 = arith.constant 0 : index
      %31 = vector.load %arg3[%c0_17, %c0_18] : memref<8x1xf32, #tpu.memory_space<vmem>>, vector<8x1xf32>
      %32 = arith.addf %30, %31 : vector<8x1xf32>
      %cst_19 = arith.constant 9.99999996E-13 : f32
      %33 = vector.broadcast %cst_19 : f32 to vector<8x1xf32>
      %34 = arith.maximumf %32, %33 : vector<8x1xf32>
      %35 = math.sqrt %34 : vector<8x1xf32>
      %c0_20 = arith.constant 0 : index
      %c0_21 = arith.constant 0 : index
      %36 = vector.load %arg4[%c0_20, %c0_21] : memref<8x1xf32, #tpu.memory_space<vmem>>, vector<8x1xf32>
      %cst_22 = arith.constant 9.99999996E-13 : f32
      %37 = vector.broadcast %cst_22 : f32 to vector<8x1xf32>
      %38 = arith.maximumf %36, %37 : vector<8x1xf32>
      %39 = math.sqrt %38 : vector<8x1xf32>
      %40 = arith.subf %39, %35 : vector<8x1xf32>
      %cst_23 = arith.constant 5.000000e-01 : f32
      %41 = vector.broadcast %cst_23 : f32 to vector<8x1xf32>
      %42 = arith.addf %40, %41 : vector<8x1xf32>
      %cst_24 = arith.constant 0.000000e+00 : f32
      %43 = vector.broadcast %cst_24 : f32 to vector<8x1xf32>
      %44 = arith.maximumf %42, %43 : vector<8x1xf32>
      %c0_25 = arith.constant 0 : index
      %c0_26 = arith.constant 0 : index
      %45 = vector.load %arg7[%c0_25, %c0_26] : memref<8x1xf32, #tpu.memory_space<vmem>>, vector<8x1xf32>
      tpu.vector_store %arg7[%c0_25, %c0_26], %44 {strides = array<i32>} : memref<8x1xf32, #tpu.memory_space<vmem>>, vector<8x1xf32>,
      %46 = arith.cmpf oge, %35, %39 : vector<8x1xf32>
      %47 = arith.extui %46 : vector<8x1xi1> to vector<8x1xi32>
      %c0_27 = arith.constant 0 : index
      %c0_28 = arith.constant 0 : index
      %48 = vector.load %arg8[%c0_27, %c0_28] : memref<8x1xi32, #tpu.memory_space<vmem>>, vector<8x1xi32>
      tpu.vector_store %arg8[%c0_27, %c0_28], %47 {strides = array<i32>} : memref<8x1xi32, #tpu.memory_space<vmem>>, vector<8x1xi32>,
    } else {
    }
    return
  }
  func.func @transform_0(%arg0: i32, %arg1: i32) -> (i32, i32) {
    %c0_i32 = arith.constant 0 : i32
    %c0_i32_0 = arith.constant 0 : i32
    return %arg0, %c0_i32 : i32, i32
  }
  func.func @transform_1(%arg0: i32, %arg1: i32) -> (i32, i32) {
    %c0_i32 = arith.constant 0 : i32
    %c0_i32_0 = arith.constant 0 : i32
    return %arg0, %c0_i32 : i32, i32
  }
  func.func @transform_2(%arg0: i32, %arg1: i32) -> (i32, i32) {
    %c0_i32 = arith.constant 0 : i32
    %c0_i32_0 = arith.constant 0 : i32
    return %arg0, %c0_i32 : i32, i32
  }
  func.func @transform_3(%arg0: i32, %arg1: i32) -> (i32, i32) {
    %c0_i32 = arith.constant 0 : i32
    %c0_i32_0 = arith.constant 0 : i32
    %c0_i32_1 = arith.constant 0 : i32
    return %c0_i32, %c0_i32_0 : i32, i32
  }
  func.func @transform_4(%arg0: i32, %arg1: i32) -> (i32, i32) {
    %c0_i32 = arith.constant 0 : i32
    %c0_i32_0 = arith.constant 0 : i32
    %c0_i32_1 = arith.constant 0 : i32
    return %c0_i32, %c0_i32_0 : i32, i32
  }
  func.func @transform_5(%arg0: i32, %arg1: i32) -> (i32, i32) {
    %c0_i32 = arith.constant 0 : i32
    %c0_i32_0 = arith.constant 0 : i32
    return %arg0, %c0_i32 : i32, i32
  }
  func.func @transform_6(%arg0: i32, %arg1: i32) -> (i32, i32) {
    %c0_i32 = arith.constant 0 : i32
    %c0_i32_0 = arith.constant 0 : i32
    return %arg0, %c0_i32 : i32, i32
  }
}

</mosaic_0001>

<bundles_post_ra>
// kernel: tpu_custom_call.1
= control target key start
LH: loop header
LB: loop body
LE: loop exit
PB: predicated region body
PF: predicated region fallthrough
CT: control target
= control target key end

     0   :  { %vm34_vm0 = vcmask 261120   ;;  %vm26_vm1 = vcmask 7168   ;;  %v138_v2 = vmov inf   ;;  %v62_v3 = vlaneseq  ;;  %s200_s3 = inlined_call_operand.vmem [shape: f32[8,32], index: 3, kind: input, shape index: {}]   ;;  %s201_s0 = inlined_call_operand.vmem [shape: f32[8,32], index: 0, kind: input, shape index: {}]   ;;  %s202_s4 = inlined_call_operand.vmem [shape: f32[1,8], index: 4, kind: input, shape index: {}]   ;;  %s203_s2 = inlined_call_operand.vmem [shape: f32[8,1], index: 2, kind: input, shape index: {}]   ;;  %s204_s1 = inlined_call_operand.vmem [shape: f32[8,1], index: 1, kind: input, shape index: {}]   ;;  %s205_s6 = inlined_call_operand.vmem [shape: s32[8,1], index: 6, kind: output, shape index: {1}]   ;;  %s206_s5 = inlined_call_operand.vmem [shape: f32[8,1], index: 5, kind: output, shape index: {0}]  }
   0x1   :  { %v29_v0 = vld [vmem:[%s200_s3] sm:$0xff]  ;;  %27 = vst.msk [vmem:[#allocation2] sm:$0xff] %vm26_vm1, %v138_v2  ;;  %vm73_vm3 = vcmask 64512   ;;  %v139_v41 = vmov 0  }
   0x2   :  { %129 = vmatpush.xpose.msk.msra.mxu0 %vm34_vm0, %v29_v0  ;;  %v28_v1 = vld [vmem:[%s201_s0] sm:$0xff]  ;;  %v63_v4 = vshrl.u32 %v62_v3, 7  ;;  %v68_v5 = vand.u32 127, %v62_v3 }
   0x3   :  { %v133_v6 = vld [vmem:[%s202_s4] ss:$0 sm:$0xff] }
   0x4   :  { %vm71_vm2 = vcmp.eq.s32.totalorder %v68_v5, %v63_v4  ;;  %v100_v11 = vld [vmem:[%s203_s2] sm:$0xff] }
   0x5   :  { %130 = vmatmul.msk.f32.vlgmr.msra.gmra.mxu0 %vm34_vm0, %v28_v1  ;;  %v101_v12 = vmax.f32 %v100_v11, 1e-12  ;;  %v85_v18 = vld [vmem:[%s204_s1] sm:$0xff] }
   0x7   :  { %134 = vrsqrt.f32 %v101_v12  ;;  %vm109_vm4 = vcmp.eq.f32.partialorder %v101_v12, inf  ;;  %v112_v32 = vand.u32 2147483648, %v101_v12  ;;  %vm111_vm5 = vcmp.eq.f32.partialorder %v101_v12, 0.0 }
   0x8   :  { %v77_v13 = vld [vmem:[#allocation2] sm:$0xff] }
   0xd   :  { %v135_v16 = vpop.eup %134 }
   0xe   :  { %v103_v17 = vmul.f32 %v135_v16, %v101_v12 }
  0x10   :  { %v104_v20 = vmul.f32 %v135_v16, %v103_v17 }
  0x12   :  { %v105_v23 = vmul.f32 0.5, %v104_v20 }
  0x14   :  { %v106_v24 = vsub.f32 1.5, %v105_v23 }
  0x16   :  { %v107_v27 = vmul.f32 %v135_v16, %v106_v24 }
  0x18   :  { %v108_v30 = vmul.f32 %v107_v27, %v101_v12 }
  0x1a   :  { %v110_v34 = vsel %vm109_vm4, %v101_v12, %v108_v30 }
  0x1b   :  { %v113_v37 = vsel %vm111_vm5, %v112_v32, %v110_v34 }
  0x82   :  { %v58_v7 = vpop.f32.mrf.mxu0 }
  0x83   :  { %v59_v8 = vadd.f32 %v133_v6, %v58_v7 }
  0x85   :  { %v72_v9 = vsel %vm71_vm2, inf, %v59_v8 }
  0x86   :  { %v74_v10 = vsel %vm73_vm3, %v72_v9, inf }
  0x87   :  { %75 = vmin.xlane.f32.xlu0 %v74_v10 }
  0xfa   :  { %v76_v14 = vpop.xlane.xlu0 %75 }
  0xfb   :  { %v78_v15 = vmin.f32 %v77_v13, %v76_v14 }
  0xfd   :  { %80 = vst.msk [vmem:[#allocation2] sm:$0xff] %vm26_vm1, %v78_v15 }
 0x104   :  { %v84_v19 = vld [vmem:[#allocation2] sm:$0xff] }
 0x105   :  { %v86_v21 = vadd.f32 %v85_v18, %v84_v19 }
 0x107   :  { %v87_v22 = vmax.f32 %v86_v21, 1e-12 }
 0x109   :  { %136 = vrsqrt.f32 %v87_v22  ;;  %vm95_vm6 = vcmp.eq.f32.partialorder %v87_v22, inf  ;;  %v98_v36 = vand.u32 2147483648, %v87_v22  ;;  %vm97_vm7 = vcmp.eq.f32.partialorder %v87_v22, 0.0 }
 0x10f   :  { %v137_v25 = vpop.eup %136 }
 0x110   :  { %v89_v26 = vmul.f32 %v137_v25, %v87_v22 }
 0x112   :  { %v90_v28 = vmul.f32 %v137_v25, %v89_v26 }
 0x114   :  { %v91_v29 = vmul.f32 0.5, %v90_v28 }
 0x116   :  { %v92_v31 = vsub.f32 1.5, %v91_v29 }
 0x118   :  { %v93_v33 = vmul.f32 %v137_v25, %v92_v31 }
 0x11a   :  { %v94_v35 = vmul.f32 %v93_v33, %v87_v22 }
 0x11c   :  { %v96_v38 = vsel %vm95_vm6, %v87_v22, %v94_v35 }
 0x11d   :  { %v99_v39 = vsel %vm97_vm7, %v98_v36, %v96_v38 }
 0x11e   :  { %v114_v40 = vsub.f32 %v113_v37, %v99_v39  ;;  %vm118_vm8 = vcmp.ge.f32.partialorder %v99_v39, %v113_v37 }
 0x11f   :  { %v119_v42 = vsel %vm118_vm8, 1, %v139_v41 }
 0x120   :  { %v115_v43 = vadd.f32 0.5, %v114_v40  ;;  %120 = vst.msk [vmem:[%s205_s6] sm:$0xff] %vm26_vm1, %v119_v42 }
 0x122   :  { %v116_v44 = vmax.f32 %v115_v43, 0.0 }
 0x124   :  { %117 = vst.msk [vmem:[%s206_s5] sm:$0xff] %vm26_vm1, %v116_v44 }

</bundles_post_ra>
